<compile_context>
chip_gen: v7x
topology: tpu7x:2x2x1
jax: 0.10.0
libtpu: 0.0.40
codegen_flags: <defaults>
</compile_context>

<pallas_src>
import functools

import jax
import jax.numpy as jnp
from jax.experimental import pallas as pl
from jax.experimental.pallas import tpu as pltpu


def _mlp_kernel(*refs, num_layers):
    """refs = (x_ref, [w, b, gamma, beta] * (L-1), w_last, b_last, out_ref)."""
    x_ref = refs[0]
    out_ref = refs[-1]
    params = refs[1:-1]

    h = x_ref[...]  # keep the input dtype (bf16 stays bf16 on the MXU)
    idx = 0
    for _ in range(num_layers - 1):
        w_ref, b_ref, g_ref, be_ref = params[idx:idx + 4]
        idx += 4
        w = w_ref[...]
        # Linear: matmul in the param dtype, accumulate in f32.
        acc = jnp.dot(h.astype(w.dtype), w, preferred_element_type=jnp.float32)
        acc = acc + b_ref[...].astype(jnp.float32)
        # LayerNorm over the feature (lane) axis: single-pass stats in f32.
        k = acc.shape[-1]
        inv_k = 1.0 / float(k)
        mean = jnp.sum(acc, axis=-1, keepdims=True) * inv_k
        ex2 = jnp.sum(acc * acc, axis=-1, keepdims=True) * inv_k
        var = jnp.maximum(ex2 - mean * mean, 0.0)
        h = (acc - mean) * jax.lax.rsqrt(var + 1e-5)
        h = h * g_ref[...].astype(jnp.float32) + be_ref[...].astype(jnp.float32)
        h = jnp.maximum(h, 0.0)  # ReLU

    w_ref, b_ref = params[idx], params[idx + 1]
    w = w_ref[...]
    acc = jnp.dot(h.astype(w.dtype), w, preferred_element_type=jnp.float32)
    acc = acc + b_ref[...].astype(jnp.float32)
    out_ref[...] = acc.astype(out_ref.dtype)


def _choose_tile_m(M, D, out_pad):
    """Pick a large, VMEM-friendly token tile (multiple of 8) dividing M."""
    # Rough f32 bytes/row: input block + a few live hidden/output slabs.
    per_row_bytes = 4 * (D + 3 * out_pad)
    cap = (8 << 20) // max(per_row_bytes, 1)  # ~8 MiB activation budget
    cap = max(8, min(2048, (cap // 8) * 8))   # safe for v7x 32 MiB scoped VMEM
    if M <= cap:
        # Whole problem fits: still prefer >= 2 grid steps (v7x has 2 cores).
        if M % 16 == 0:
            return M // 2
        return M
    best = None
    for t in range(8, cap + 1, 8):
        if M % t == 0:
            best = t
    return best if best is not None else M


def mlp_pallas(x2d, flat_params, num_layers, out_dim, tile_m=None):
    """x2d: (M, D) tokens.  flat_params: list of 2D param arrays.

    Returns (M, out_dim) in x2d.dtype.
    """
    M, D = x2d.shape
    out_pad = pl.cdiv(out_dim, 128) * 128  # lane-dense output width

    params = list(flat_params)
    if out_pad != out_dim:
        pad = out_pad - out_dim
        params[-2] = jnp.pad(params[-2], ((0, 0), (0, pad)))  # last weight
        params[-1] = jnp.pad(params[-1], ((0, 0), (0, pad)))  # last bias

    if tile_m is None:
        tile_m = _choose_tile_m(M, D, out_pad)
    assert M % tile_m == 0, "tile_m must divide the number of tokens"

    in_specs = [pl.BlockSpec((tile_m, D), lambda i: (i, 0))]
    for p in params:
        # Full-array blocks with constant block index: fetched once, not
        # re-DMA'd every grid step.
        in_specs.append(pl.BlockSpec(p.shape, lambda i, nd=p.ndim: (0,) * nd))
    out_spec = pl.BlockSpec((tile_m, out_pad), lambda i: (i, 0))

    kernel = functools.partial(_mlp_kernel, num_layers=num_layers)

    y = pl.pallas_call(
        kernel,
        out_shape=jax.ShapeDtypeStruct((M, out_pad), x2d.dtype),
        grid_spec=pltpu.PrefetchScalarGridSpec(
            num_scalar_prefetch=0,
            grid=(M // tile_m,),
            in_specs=in_specs,
            out_specs=out_spec,
        ),
        compiler_params=pltpu.CompilerParams(
            dimension_semantics=("parallel",)),
    )(x2d, *params)

    if out_pad != out_dim:
        y = y[:, :out_dim]  # fuses with the downstream patch-unshuffle pass
    return y


def init_upsample_params(key, embed_dim, in_chans, patch_size, num_layers):
    """Deterministic synthetic params matching the torch module's shapes.

    Linear weights stored as (in, out) (transposed w.r.t. torch's (out, in)),
    biases / LN params stored as (1, dim) for TPU-friendly 2D layout.
    """
    upsampling_dim = in_chans * patch_size * patch_size
    hidden = [upsampling_dim] * (num_layers - 1)
    dims_in = [embed_dim] + hidden
    dims_out = hidden + [upsampling_dim]

    params = []
    for i, (n, k) in enumerate(zip(dims_in, dims_out)):
        key, wk = jax.random.split(key)
        w = jax.random.normal(wk, (n, k), jnp.float32) * 0.02
        b = jnp.full((1, k), 0.01, jnp.float32)
        params.append(w)
        params.append(b)
        if i < num_layers - 1:
            params.append(jnp.ones((1, k), jnp.float32))   # gamma
            params.append(jnp.zeros((1, k), jnp.float32))  # beta
    return params


def upsample_layer(x, flat_params, *, in_chans, image_size, patch_size,
                   num_layers, tile_m=None):
    """Forward of UpsampleLayer.  x: (B, H/P * W/P, D)  ->  (B, C, H, W)."""
    B, N, D = x.shape
    H, W = image_size
    P = patch_size
    C = in_chans
    assert N == (H // P) * (W // P)
    out_dim = C * P * P

    x2d = x.reshape(B * N, D)
    y2d = mlp_pallas(x2d, flat_params, num_layers, out_dim, tile_m)

    # (B*N, C*P*P) -> (B, H/P, W/P, C, P, P) -> (B, C, H/P, P, W/P, P) -> (B, C, H, W)
    y = y2d.reshape(B, H // P, W // P, C, P, P)
    y = jnp.transpose(y, (0, 3, 1, 4, 2, 5))
    y = y.reshape(B, C, H, W)
    return y


def _reference_upsample(x, flat_params, *, in_chans, image_size, patch_size,
                        num_layers):
    """Pure-JAX reference (mirrors torch semantics; same dtype handling)."""
    B, N, D = x.shape
    H, W = image_size
    P, C = patch_size, in_chans
    h = x.reshape(B * N, D)
    idx = 0
    for _ in range(num_layers - 1):
        w, b, gamma, beta = flat_params[idx:idx + 4]
        idx += 4
        h = jnp.dot(h.astype(w.dtype), w, preferred_element_type=jnp.float32)
        h = h + b.astype(jnp.float32)
        mean = jnp.mean(h, axis=-1, keepdims=True)
        var = jnp.mean((h - mean) ** 2, axis=-1, keepdims=True)
        h = (h - mean) / jnp.sqrt(var + 1e-5)
        h = h * gamma.astype(jnp.float32) + beta.astype(jnp.float32)
        h = jnp.maximum(h, 0.0)
    w, b = flat_params[idx], flat_params[idx + 1]
    h = jnp.dot(h.astype(w.dtype), w, preferred_element_type=jnp.float32)
    h = (h + b.astype(jnp.float32)).astype(x.dtype)
    y = h.reshape(B, H // P, W // P, C, P, P)
    y = jnp.transpose(y, (0, 3, 1, 4, 2, 5)).reshape(B, C, H, W)
    return y


if __name__ == "__main__":
    # Small config consistent with the module:
    #   embed_dim D = 32, in_chans C = 4, image 16x16, patch P = 4, L = 3
    #   -> tokens N = (16/4)*(16/4) = 16, upsampling_dim = 4*4*4 = 64
    B = 2
    embed_dim = 32
    in_chans = 4
    image_size = (16, 16)
    patch_size = 4
    num_layers = 3
    N = (image_size[0] // patch_size) * (image_size[1] // patch_size)

    key = jax.random.PRNGKey(0)
    key, xk, pk = jax.random.split(key, 3)
    x = jax.random.normal(xk, (B, N, embed_dim), jnp.float32)
    flat_params = init_upsample_params(pk, embed_dim, in_chans, patch_size,
                                       num_layers)

    fwd = jax.jit(functools.partial(
        upsample_layer, in_chans=in_chans, image_size=image_size,
        patch_size=patch_size, num_layers=num_layers))

    # f32 path: exact semantic parity with the torch float32 module.
    out = jax.block_until_ready(fwd(x, flat_params))
    ref = _reference_upsample(x, flat_params, in_chans=in_chans,
                              image_size=image_size, patch_size=patch_size,
                              num_layers=num_layers)
    assert out.shape == (B, in_chans, image_size[0], image_size[1])
    assert jnp.allclose(out, ref, atol=1e-4, rtol=1e-4), \
        float(jnp.max(jnp.abs(out - ref)))

    # bf16 fast path: MXU-native matmuls, f32 LayerNorm stats.
    x_bf = x.astype(jnp.bfloat16)
    params_bf = [p.astype(jnp.bfloat16) for p in flat_params]
    out_bf = jax.block_until_ready(fwd(x_bf, params_bf))
    ref_bf = _reference_upsample(x_bf, params_bf, in_chans=in_chans,
                                 image_size=image_size, patch_size=patch_size,
                                 num_layers=num_layers)
    assert jnp.allclose(out_bf.astype(jnp.float32),
                        ref_bf.astype(jnp.float32), atol=1e-2, rtol=2e-2), \
        float(jnp.max(jnp.abs(out_bf.astype(jnp.float32) -
                              ref_bf.astype(jnp.float32))))

    print("KERNEL_OK")
</pallas_src>

<mosaic_0001>
module attributes {stable_mosaic.version = 11 : i64} {
  func.func @_mlp_kernel(%arg0: i32, %arg1: memref<16x32xf32, #tpu.memory_space<vmem>>, %arg2: memref<32x64xf32, #tpu.memory_space<vmem>>, %arg3: memref<1x64xf32, #tpu.memory_space<vmem>>, %arg4: memref<1x64xf32, #tpu.memory_space<vmem>>, %arg5: memref<1x64xf32, #tpu.memory_space<vmem>>, %arg6: memref<64x64xf32, #tpu.memory_space<vmem>>, %arg7: memref<1x64xf32, #tpu.memory_space<vmem>>, %arg8: memref<1x64xf32, #tpu.memory_space<vmem>>, %arg9: memref<1x64xf32, #tpu.memory_space<vmem>>, %arg10: memref<64x128xf32, #tpu.memory_space<vmem>>, %arg11: memref<1x128xf32, #tpu.memory_space<vmem>>, %arg12: memref<16x128xf32, #tpu.memory_space<vmem>>) attributes {dimension_semantics = [#tpu.dimension_semantics<parallel>], iteration_bounds = array<i64: 2>, scalar_prefetch = 0 : i64, scratch_operands = 0 : i64, tpu.core_type = #tpu.core_type<tc>, window_params = [{transform_indices = @transform_0, window_bounds = array<i64: 16, 32>}, {pipeline_mode = #tpu.pipeline_mode<synchronous>, transform_indices = @transform_1, window_bounds = array<i64: 32, 64>}, {pipeline_mode = #tpu.pipeline_mode<synchronous>, transform_indices = @transform_2, window_bounds = array<i64: 1, 64>}, {pipeline_mode = #tpu.pipeline_mode<synchronous>, transform_indices = @transform_3, window_bounds = array<i64: 1, 64>}, {pipeline_mode = #tpu.pipeline_mode<synchronous>, transform_indices = @transform_4, window_bounds = array<i64: 1, 64>}, {pipeline_mode = #tpu.pipeline_mode<synchronous>, transform_indices = @transform_5, window_bounds = array<i64: 64, 64>}, {pipeline_mode = #tpu.pipeline_mode<synchronous>, transform_indices = @transform_6, window_bounds = array<i64: 1, 64>}, {pipeline_mode = #tpu.pipeline_mode<synchronous>, transform_indices = @transform_7, window_bounds = array<i64: 1, 64>}, {pipeline_mode = #tpu.pipeline_mode<synchronous>, transform_indices = @transform_8, window_bounds = array<i64: 1, 64>}, {pipeline_mode = #tpu.pipeline_mode<synchronous>, transform_indices = @transform_9, window_bounds = array<i64: 64, 128>}, {pipeline_mode = #tpu.pipeline_mode<synchronous>, transform_indices = @transform_10, window_bounds = array<i64: 1, 128>}, {transform_indices = @transform_11, window_bounds = array<i64: 16, 128>}]} {
    %c0 = arith.constant 0 : index
    %c0_0 = arith.constant 0 : index
    %0 = vector.load %arg1[%c0, %c0_0] : memref<16x32xf32, #tpu.memory_space<vmem>>, vector<16x32xf32>
    %c0_1 = arith.constant 0 : index
    %c0_2 = arith.constant 0 : index
    %1 = vector.load %arg2[%c0_1, %c0_2] : memref<32x64xf32, #tpu.memory_space<vmem>>, vector<32x64xf32>
    %cst = arith.constant dense<0.000000e+00> : vector<16x64xf32>
    %2 = tpu.matmul %0, %1, %cst {dimension_numbers = #tpu.dot_dimension_numbers<[1], [0], [0], [1], [0, 0, 1, 1], [], []>} : vector<16x32xf32>, vector<32x64xf32>, vector<16x64xf32> -> vector<16x64xf32>
    %c0_3 = arith.constant 0 : index
    %c0_4 = arith.constant 0 : index
    %3 = vector.load %arg3[%c0_3, %c0_4] : memref<1x64xf32, #tpu.memory_space<vmem>>, vector<1x64xf32>
    %4 = vector.broadcast %3 : vector<1x64xf32> to vector<16x64xf32>
    %5 = arith.addf %2, %4 : vector<16x64xf32>
    %cst_5 = arith.constant dense<0.000000e+00> : vector<16xf32>
    %6 = vector.multi_reduction <add>, %5, %cst_5 [1] : vector<16x64xf32> to vector<16xf32>
    %7 = vector.shape_cast %6 : vector<16xf32> to vector<16x1xf32>
    %cst_6 = arith.constant 1.562500e-02 : f32
    %8 = vector.broadcast %cst_6 : f32 to vector<16x1xf32>
    %9 = arith.mulf %7, %8 : vector<16x1xf32>
    %10 = arith.mulf %5, %5 : vector<16x64xf32>
    %cst_7 = arith.constant dense<0.000000e+00> : vector<16xf32>
    %11 = vector.multi_reduction <add>, %10, %cst_7 [1] : vector<16x64xf32> to vector<16xf32>
    %12 = vector.shape_cast %11 : vector<16xf32> to vector<16x1xf32>
    %cst_8 = arith.constant 1.562500e-02 : f32
    %13 = vector.broadcast %cst_8 : f32 to vector<16x1xf32>
    %14 = arith.mulf %12, %13 : vector<16x1xf32>
    %15 = arith.mulf %9, %9 : vector<16x1xf32>
    %16 = arith.subf %14, %15 : vector<16x1xf32>
    %cst_9 = arith.constant 0.000000e+00 : f32
    %17 = vector.broadcast %cst_9 : f32 to vector<16x1xf32>
    %18 = arith.maximumf %16, %17 : vector<16x1xf32>
    %19 = vector.broadcast %9 : vector<16x1xf32> to vector<16x64xf32>
    %20 = arith.subf %5, %19 : vector<16x64xf32>
    %cst_10 = arith.constant 9.99999974E-6 : f32
    %21 = vector.broadcast %cst_10 : f32 to vector<16x1xf32>
    %22 = arith.addf %18, %21 : vector<16x1xf32>
    %23 = math.rsqrt %22 : vector<16x1xf32>
    %24 = vector.broadcast %23 : vector<16x1xf32> to vector<16x64xf32>
    %25 = arith.mulf %20, %24 : vector<16x64xf32>
    %c0_11 = arith.constant 0 : index
    %c0_12 = arith.constant 0 : index
    %26 = vector.load %arg4[%c0_11, %c0_12] : memref<1x64xf32, #tpu.memory_space<vmem>>, vector<1x64xf32>
    %27 = vector.broadcast %26 : vector<1x64xf32> to vector<16x64xf32>
    %28 = arith.mulf %25, %27 : vector<16x64xf32>
    %c0_13 = arith.constant 0 : index
    %c0_14 = arith.constant 0 : index
    %29 = vector.load %arg5[%c0_13, %c0_14] : memref<1x64xf32, #tpu.memory_space<vmem>>, vector<1x64xf32>
    %30 = vector.broadcast %29 : vector<1x64xf32> to vector<16x64xf32>
    %31 = arith.addf %28, %30 : vector<16x64xf32>
    %cst_15 = arith.constant 0.000000e+00 : f32
    %32 = vector.broadcast %cst_15 : f32 to vector<16x64xf32>
    %33 = arith.maximumf %31, %32 : vector<16x64xf32>
    %c0_16 = arith.constant 0 : index
    %c0_17 = arith.constant 0 : index
    %34 = vector.load %arg6[%c0_16, %c0_17] : memref<64x64xf32, #tpu.memory_space<vmem>>, vector<64x64xf32>
    %cst_18 = arith.constant dense<0.000000e+00> : vector<16x64xf32>
    %35 = tpu.matmul %33, %34, %cst_18 {dimension_numbers = #tpu.dot_dimension_numbers<[1], [0], [0], [1], [0, 0, 1, 1], [], []>} : vector<16x64xf32>, vector<64x64xf32>, vector<16x64xf32> -> vector<16x64xf32>
    %c0_19 = arith.constant 0 : index
    %c0_20 = arith.constant 0 : index
    %36 = vector.load %arg7[%c0_19, %c0_20] : memref<1x64xf32, #tpu.memory_space<vmem>>, vector<1x64xf32>
    %37 = vector.broadcast %36 : vector<1x64xf32> to vector<16x64xf32>
    %38 = arith.addf %35, %37 : vector<16x64xf32>
    %cst_21 = arith.constant dense<0.000000e+00> : vector<16xf32>
    %39 = vector.multi_reduction <add>, %38, %cst_21 [1] : vector<16x64xf32> to vector<16xf32>
    %40 = vector.shape_cast %39 : vector<16xf32> to vector<16x1xf32>
    %cst_22 = arith.constant 1.562500e-02 : f32
    %41 = vector.broadcast %cst_22 : f32 to vector<16x1xf32>
    %42 = arith.mulf %40, %41 : vector<16x1xf32>
    %43 = arith.mulf %38, %38 : vector<16x64xf32>
    %cst_23 = arith.constant dense<0.000000e+00> : vector<16xf32>
    %44 = vector.multi_reduction <add>, %43, %cst_23 [1] : vector<16x64xf32> to vector<16xf32>
    %45 = vector.shape_cast %44 : vector<16xf32> to vector<16x1xf32>
    %cst_24 = arith.constant 1.562500e-02 : f32
    %46 = vector.broadcast %cst_24 : f32 to vector<16x1xf32>
    %47 = arith.mulf %45, %46 : vector<16x1xf32>
    %48 = arith.mulf %42, %42 : vector<16x1xf32>
    %49 = arith.subf %47, %48 : vector<16x1xf32>
    %cst_25 = arith.constant 0.000000e+00 : f32
    %50 = vector.broadcast %cst_25 : f32 to vector<16x1xf32>
    %51 = arith.maximumf %49, %50 : vector<16x1xf32>
    %52 = vector.broadcast %42 : vector<16x1xf32> to vector<16x64xf32>
    %53 = arith.subf %38, %52 : vector<16x64xf32>
    %cst_26 = arith.constant 9.99999974E-6 : f32
    %54 = vector.broadcast %cst_26 : f32 to vector<16x1xf32>
    %55 = arith.addf %51, %54 : vector<16x1xf32>
    %56 = math.rsqrt %55 : vector<16x1xf32>
    %57 = vector.broadcast %56 : vector<16x1xf32> to vector<16x64xf32>
    %58 = arith.mulf %53, %57 : vector<16x64xf32>
    %c0_27 = arith.constant 0 : index
    %c0_28 = arith.constant 0 : index
    %59 = vector.load %arg8[%c0_27, %c0_28] : memref<1x64xf32, #tpu.memory_space<vmem>>, vector<1x64xf32>
    %60 = vector.broadcast %59 : vector<1x64xf32> to vector<16x64xf32>
    %61 = arith.mulf %58, %60 : vector<16x64xf32>
    %c0_29 = arith.constant 0 : index
    %c0_30 = arith.constant 0 : index
    %62 = vector.load %arg9[%c0_29, %c0_30] : memref<1x64xf32, #tpu.memory_space<vmem>>, vector<1x64xf32>
    %63 = vector.broadcast %62 : vector<1x64xf32> to vector<16x64xf32>
    %64 = arith.addf %61, %63 : vector<16x64xf32>
    %cst_31 = arith.constant 0.000000e+00 : f32
    %65 = vector.broadcast %cst_31 : f32 to vector<16x64xf32>
    %66 = arith.maximumf %64, %65 : vector<16x64xf32>
    %c0_32 = arith.constant 0 : index
    %c0_33 = arith.constant 0 : index
    %67 = vector.load %arg10[%c0_32, %c0_33] : memref<64x128xf32, #tpu.memory_space<vmem>>, vector<64x128xf32>
    %cst_34 = arith.constant dense<0.000000e+00> : vector<16x128xf32>
    %68 = tpu.matmul %66, %67, %cst_34 {dimension_numbers = #tpu.dot_dimension_numbers<[1], [0], [0], [1], [0, 0, 1, 1], [], []>} : vector<16x64xf32>, vector<64x128xf32>, vector<16x128xf32> -> vector<16x128xf32>
    %c0_35 = arith.constant 0 : index
    %c0_36 = arith.constant 0 : index
    %69 = vector.load %arg11[%c0_35, %c0_36] : memref<1x128xf32, #tpu.memory_space<vmem>>, vector<1x128xf32>
    %70 = vector.broadcast %69 : vector<1x128xf32> to vector<16x128xf32>
    %71 = arith.addf %68, %70 : vector<16x128xf32>
    %c0_37 = arith.constant 0 : index
    %c0_38 = arith.constant 0 : index
    %72 = vector.load %arg12[%c0_37, %c0_38] : memref<16x128xf32, #tpu.memory_space<vmem>>, vector<16x128xf32>
    tpu.vector_store %arg12[%c0_37, %c0_38], %71 {strides = array<i32>} : memref<16x128xf32, #tpu.memory_space<vmem>>, vector<16x128xf32>,
    return
  }
  func.func @transform_0(%arg0: i32) -> (i32, i32) {
    %c0_i32 = arith.constant 0 : i32
    %c0_i32_0 = arith.constant 0 : i32
    return %arg0, %c0_i32 : i32, i32
  }
  func.func @transform_1(%arg0: i32) -> (i32, i32) {
    %c0_i32 = arith.constant 0 : i32
    %c0_i32_0 = arith.constant 0 : i32
    %c0_i32_1 = arith.constant 0 : i32
    return %c0_i32, %c0_i32_0 : i32, i32
  }
  func.func @transform_2(%arg0: i32) -> (i32, i32) {
    %c0_i32 = arith.constant 0 : i32
    %c0_i32_0 = arith.constant 0 : i32
    %c0_i32_1 = arith.constant 0 : i32
    return %c0_i32, %c0_i32_0 : i32, i32
  }
  func.func @transform_3(%arg0: i32) -> (i32, i32) {
    %c0_i32 = arith.constant 0 : i32
    %c0_i32_0 = arith.constant 0 : i32
    %c0_i32_1 = arith.constant 0 : i32
    return %c0_i32, %c0_i32_0 : i32, i32
  }
  func.func @transform_4(%arg0: i32) -> (i32, i32) {
    %c0_i32 = arith.constant 0 : i32
    %c0_i32_0 = arith.constant 0 : i32
    %c0_i32_1 = arith.constant 0 : i32
    return %c0_i32, %c0_i32_0 : i32, i32
  }
  func.func @transform_5(%arg0: i32) -> (i32, i32) {
    %c0_i32 = arith.constant 0 : i32
    %c0_i32_0 = arith.constant 0 : i32
    %c0_i32_1 = arith.constant 0 : i32
    return %c0_i32, %c0_i32_0 : i32, i32
  }
  func.func @transform_6(%arg0: i32) -> (i32, i32) {
    %c0_i32 = arith.constant 0 : i32
    %c0_i32_0 = arith.constant 0 : i32
    %c0_i32_1 = arith.constant 0 : i32
    return %c0_i32, %c0_i32_0 : i32, i32
  }
  func.func @transform_7(%arg0: i32) -> (i32, i32) {
    %c0_i32 = arith.constant 0 : i32
    %c0_i32_0 = arith.constant 0 : i32
    %c0_i32_1 = arith.constant 0 : i32
    return %c0_i32, %c0_i32_0 : i32, i32
  }
  func.func @transform_8(%arg0: i32) -> (i32, i32) {
    %c0_i32 = arith.constant 0 : i32
    %c0_i32_0 = arith.constant 0 : i32
    %c0_i32_1 = arith.constant 0 : i32
    return %c0_i32, %c0_i32_0 : i32, i32
  }
  func.func @transform_9(%arg0: i32) -> (i32, i32) {
    %c0_i32 = arith.constant 0 : i32
    %c0_i32_0 = arith.constant 0 : i32
    %c0_i32_1 = arith.constant 0 : i32
    return %c0_i32, %c0_i32_0 : i32, i32
  }
  func.func @transform_10(%arg0: i32) -> (i32, i32) {
    %c0_i32 = arith.constant 0 : i32
    %c0_i32_0 = arith.constant 0 : i32
    %c0_i32_1 = arith.constant 0 : i32
    return %c0_i32, %c0_i32_0 : i32, i32
  }
  func.func @transform_11(%arg0: i32) -> (i32, i32) {
    %c0_i32 = arith.constant 0 : i32
    %c0_i32_0 = arith.constant 0 : i32
    return %arg0, %c0_i32 : i32, i32
  }
}

</mosaic_0001>

<bundles_post_ra>
// kernel: upsample_layer.1
= control target key start
LH: loop header
LB: loop body
LE: loop exit
PB: predicated region body
PF: predicated region fallthrough
CT: control target
= control target key end

     0   :  { %s1063_s17 = smov 0   ;;  %s1180_s0 = inlined_call_operand.vmem [shape: f32[32,32], index: 0, kind: input, shape index: {}]   ;;  %s1181_s1 = inlined_call_operand.vmem [shape: f32[32,64], index: 1, kind: input, shape index: {}]   ;;  %s1182_s2 = inlined_call_operand.vmem [shape: f32[1,64], index: 2, kind: input, shape index: {}]   ;;  %s1183_s3 = inlined_call_operand.vmem [shape: f32[1,64], index: 3, kind: input, shape index: {}]   ;;  %s1184_s4 = inlined_call_operand.vmem [shape: f32[1,64], index: 4, kind: input, shape index: {}]   ;;  %s1185_s5 = inlined_call_operand.vmem [shape: f32[64,64], index: 5, kind: input, shape index: {}]   ;;  %s1186_s6 = inlined_call_operand.vmem [shape: f32[1,64], index: 6, kind: input, shape index: {}]   ;;  %s1187_s7 = inlined_call_operand.vmem [shape: f32[1,64], index: 7, kind: input, shape index: {}]   ;;  %s1188_s8 = inlined_call_operand.vmem [shape: f32[1,64], index: 8, kind: input, shape index: {}]   ;;  %s1189_s9 = inlined_call_operand.vmem [shape: f32[64,128], index: 9, kind: input, shape index: {}]   ;;  %s1190_s10 = inlined_call_operand.vmem [shape: f32[1,128], index: 10, kind: input, shape index: {}]   ;;  %s1191_s11 = inlined_call_operand.vmem [shape: f32[32,128], index: 11, kind: output, shape index: {}]  }
   0x1 LB: > { %s840_s18 = sadd.s32 4294967295, %s1001_s17   ;;  %p844_p0 = scmp.ge.s32.totalorder %s1001_s17, 1  ;;  %s1001_s17 = sphi %s1063_s17, %s21_s17  }
   0x2   : > { %p338_p1 = scmp.lt.s32.totalorder %s1001_s17, 3 }
   0x4   : > { %p339_p2 = pnand %p844_p0, %p338_p1 }
   0x5   : > { %v392_v0 = vld [vmem:[%s1181_s1] sm:$0xff] (!%p339_p2)  ;;  %v393_v1 = vld [vmem:[%s1181_s1 + $0x8] sm:$0xff] (!%p339_p2)  ;;  %v394_v2 = vld [vmem:[%s1181_s1 + $0x10] sm:$0xff] (!%p339_p2)  ;;  %s845_s25 = sshll.u32 (!%p339_p2), %s840_s18, 1  ;;  %vm403_vm0 = vcmask (!%p339_p2), 261120   ;;  %vm485_vm1 = vcmask (!%p339_p2), 523264  }
   0x6   : > { %342 = sbr.rel (%p339_p2) target bundleno = 1015 (0x3f7), region = 64  ;;  %v939_v3 = vpack.c.bf16 (!%p339_p2), %v393_v1, %v392_v0  ;;  %v395_v4 = vld [vmem:[%s1181_s1 + $0x18] sm:$0xff] (!%p339_p2)  ;;  %p379_p3 = scmp.lt.s32.totalorder (!%p339_p2), %s845_s25, 3  ;;  %v849_v8 = vld [vmem:[%s1182_s2] ss:$0 sm:$0xff] (!%p339_p2)  ;;  %v539_v20 = vld [vmem:[%s1185_s5 + $0x8] sm:$0xff] (!%p339_p2) }
   0x7   : > { %v943_v5 = vpack.c.bf16 (!%p339_p2), %v395_v4, %v394_v2  ;;  %v538_v19 = vld [vmem:[%s1185_s5] sm:$0xff] (!%p339_p2)  ;;  %v540_v21 = vld [vmem:[%s1185_s5 + $0x10] sm:$0xff] (!%p339_p2)  ;;  %v541_v23 = vld [vmem:[%s1185_s5 + $0x18] sm:$0xff] (!%p339_p2) }
   0x8   : > { %940 = vmatprep.subr.bf16.mxu0 (!%p339_p2), %v939_v3  ;;  %v947_v22 = vpack.c.bf16 (!%p339_p2), %v539_v20, %v538_v19  ;;  %v951_v24 = vpack.c.bf16 (!%p339_p2), %v541_v23, %v540_v21  ;;  %v542_v25 = vld [vmem:[%s1185_s5 + $0x20] sm:$0xff] (!%p339_p2)  ;;  %v543_v26 = vld [vmem:[%s1185_s5 + $0x28] sm:$0xff] (!%p339_p2)  ;;  %v544_v28 = vld [vmem:[%s1185_s5 + $0x30] sm:$0xff] (!%p339_p2) }
   0x9   : > { %942 = vmatpush3.bf16.msra.mxu0 (!%p339_p2), %v939_v3  ;;  %v955_v27 = vpack.c.bf16 (!%p339_p2), %v543_v26, %v542_v25  ;;  %v545_v29 = vld [vmem:[%s1185_s5 + $0x38] sm:$0xff] (!%p339_p2)  ;;  %v852_v49 = vld [vmem:[%s1183_s3] ss:$0 sm:$0xff] (!%p339_p2) }
   0xa   : > { %944 = vmatprep.subr.bf16.mxu0 (!%p339_p2), %v943_v5  ;;  %948 = vmatprep.subr.bf16.mxu1 (!%p339_p2), %v947_v22  ;;  %v959_v30 = vpack.c.bf16 (!%p339_p2), %v545_v29, %v544_v28  ;;  %v853_v51 = vld [vmem:[%s1184_s4] ss:$0 sm:$0xff] (!%p339_p2) }
   0xb   : > { %950 = vmatpush3.bf16.msra.mxu1 (!%p339_p2), %v947_v22  ;;  %v854_v61 = vld [vmem:[%s1186_s6] ss:$0 sm:$0xff] (!%p339_p2) }
   0xc   : > { %952 = vmatprep.subr.bf16.mxu1 (!%p339_p2), %v951_v24 }
   0xd   : > { %s1193_s25 = smov (!%p379_p3, %s845_s25), 3  ;;  %946 = vmatpush3.bf16.msra.mxu0 %v943_v5 }
   0xe   : > { %s846_s28 = sshll.u32 %s1193_s25, 3 }
   0xf   : > { %s382_s12 = scalar_lea.vmem %s1180_s0, %s846_s28  ;;  %954 = vmatpush3.bf16.msra.mxu1 %v951_v24  ;;  %s388_s13 = scalar_lea.vmem %s1191_s11, %s846_s28 }
  0x10   : > { %v390_v6 = vld [vmem:[%s382_s12] sm:$0xff]  ;;  %v391_v7 = vld [vmem:[%s382_s12 + $0x8] sm:$0xff]  ;;  %956 = vmatprep.subr.bf16.mxu1 %v955_v27 }
  0x11   : > { %898 = vmatprep.mubr.msk.f32.mxu0 %vm403_vm0, %v390_v6 }
  0x12   : > { %899 = vmatmul.mubr.msk.f32.vlgmr.msra.gmra.mrb[0].mxu0 %vm403_vm0, %v391_v7 }
  0x13   : > { %958 = vmatpush3.bf16.msra.mxu1 %v955_v27 }
  0x14   : > { %960 = vmatprep.subr.bf16.mxu1 %v959_v30 }
  0x17   : > { %962 = vmatpush3.bf16.msra.mxu1 %v959_v30 }
  0xe5   : > { %v900_v9 = vpop.f32.mrb[0].mxu0 }
  0xe6   : > { %v476_v10 = vpop.f32.mrb[1].mxu0  ;;  %v482_v11 = vadd.f32 %v900_v9, %v849_v8  ;;  %v687_v9 = vld [vmem:[%s1189_s9 + $0x8] sm:$0xff] }
  0xe7   : > { %v477_v12 = vadd.f32 %v849_v8, %v476_v10  ;;  %v686_v8 = vld [vmem:[%s1189_s9] sm:$0xff]  ;;  %v688_v10 = vld [vmem:[%s1189_s9 + $0x10] sm:$0xff] }
  0xe8   : > { %v495_v16 = vmul.f32 %v482_v11, %v482_v11  ;;  %v489_v17 = vsel %vm485_vm1, %v482_v11, 0.0 }
  0xe9   : > { %v486_v13 = vsel %vm485_vm1, %v477_v12, 0.0  ;;  %v494_v14 = vmul.f32 %v477_v12, %v477_v12 }
  0xea   : > { %487 = vadd.xlane.f32.xlu0 %v486_v13  ;;  %v499_v18 = vsel %vm485_vm1, %v495_v16, 0.0 }
  0xeb   : > { %v496_v15 = vsel %vm485_vm1, %v494_v14, 0.0  ;;  %v690_v14 = vld [vmem:[%s1189_s9 + $0x20] sm:$0xff] }
  0xec   : > { %497 = vadd.xlane.f32.xlu1 %v496_v15  ;;  %v691_v15 = vld [vmem:[%s1189_s9 + $0x28] sm:$0xff] }
  0xed   : > { %v971_v16 = vpack.c.bf16 %v691_v15, %v690_v14 }
  0xee   : > { %490 = vadd.xlane.f32.xlu0 %v489_v17  ;;  %v692_v17 = vld [vmem:[%s1189_s9 + $0x30] sm:$0xff] }
  0xf0   : > { %500 = vadd.xlane.f32.xlu1 %v499_v18  ;;  %v693_v18 = vld [vmem:[%s1189_s9 + $0x38] sm:$0xff] }
  0xf1   : > { %v975_v19 = vpack.c.bf16 %v693_v18, %v692_v17 }
 0x177   : > { %v488_v31 = vpop.xlane.xlu0 %487 }
 0x178   : > { %v492_v32 = vmul.f32 0.015625, %v488_v31 }
 0x179   : > { %v498_v33 = vpop.xlane.xlu1 %497 }
 0x17a   : > { %v504_v34 = vmul.f32 %v492_v32, %v492_v32  ;;  %v502_v35 = vmul.f32 0.015625, %v498_v33  ;;  %v510_v47 = vsub.f32 %v477_v12, %v492_v32  ;;  %v689_v12 = vld [vmem:[%s1189_s9 + $0x18] sm:$0xff] }
 0x17b   : > { %v491_v36 = vpop.xlane.xlu0 %490  ;;  %v967_v13 = vpack.c.bf16 %v689_v12, %v688_v10 }
 0x17c   : > { %v506_v37 = vsub.f32 %v502_v35, %v504_v34  ;;  %v493_v38 = vmul.f32 0.015625, %v491_v36 }
 0x17d   : > { %v501_v39 = vpop.xlane.xlu1 %500 }
 0x17e   : > { %v508_v40 = vmax.f32 %v506_v37, 0.0  ;;  %v505_v41 = vmul.f32 %v493_v38, %v493_v38  ;;  %v503_v42 = vmul.f32 0.015625, %v501_v39  ;;  %v511_v52 = vsub.f32 %v482_v11, %v493_v38  ;;  %v857_v39 = vld [vmem:[%s1187_s7] ss:$0 sm:$0xff] }
 0x17f   : > { %v963_v11 = vpack.c.bf16 %v687_v9, %v686_v8 }
 0x180   : > { %v512_v43 = vadd.f32 1e-05, %v508_v40  ;;  %v507_v44 = vsub.f32 %v503_v42, %v505_v41 }
 0x181   : > { %964 = vmatprep.subr.bf16.mxu0 %v963_v11 }
 0x182   : > { %987 = vrsqrt.f32 %v512_v43  ;;  %v509_v45 = vmax.f32 %v507_v44, 0.0  ;;  %966 = vmatpush3.bf16.msra.mxu0 %v963_v11  ;;  %v858_v43 = vld [vmem:[%s1188_s8] ss:$0 sm:$0xff] }
 0x183   : > { %968 = vmatprep.subr.bf16.mxu0 %v967_v13 }
 0x184   : > { %v513_v46 = vadd.f32 1e-05, %v509_v45 }
 0x186   : > { %989 = vrsqrt.f32 %v513_v46  ;;  %970 = vmatpush3.bf16.msra.mxu0 %v967_v13 }
 0x187   : > { %972 = vmatprep.subr.bf16.mxu0 %v971_v16 }
 0x18a   : > { %974 = vmatpush3.bf16.msra.mxu0 %v971_v16 }
 0x18b   : > { %976 = vmatprep.subr.bf16.mxu0 %v975_v19 }
 0x18c   : > { %v988_v48 = vpop.eup %987 }
 0x18d   : > { %v516_v50 = vmul.f32 %v988_v48, %v510_v47 }
 0x18e   : > { %978 = vmatpush3.bf16.msra.mxu0 %v975_v19 }
 0x18f   : > { %v525_v53 = vmul.f32 %v852_v49, %v516_v50  ;;  %v859_v50 = vld [vmem:[%s1190_s10] ss:$0 sm:$0xff] }
 0x190   : > { %v990_v54 = vpop.eup %989 }
 0x191   : > { %v517_v55 = vmul.f32 %v990_v54, %v511_v52  ;;  %v534_v56 = vadd.f32 %v853_v51, %v525_v53 }
 0x193   : > { %v526_v57 = vmul.f32 %v852_v49, %v517_v55  ;;  %v536_v58 = vmax.f32 %v534_v56, 0.0 }
 0x195   : > { %v535_v59 = vadd.f32 %v853_v51, %v526_v57  ;;  %917 = vmatprep.mubr.msk.f32.mxu1 %vm485_vm1, %v536_v58 }
 0x197   : > { %v537_v60 = vmax.f32 %v535_v59, 0.0 }
 0x199   : > { %918 = vmatmul.mubr.msk.f32.vlgmr.msra.gmra.mrb[0].mxu1 %vm485_vm1, %v537_v60 }
 0x26c   : > { %v919_v62 = vpop.f32.mrb[0].mxu1 }
 0x26d   : > { %v631_v63 = vadd.f32 %v919_v62, %v854_v61  ;;  %v625_v0 = vpop.f32.mrb[1].mxu1 }
 0x26e   : > { %v626_v1 = vadd.f32 %v854_v61, %v625_v0 }
 0x26f   : > { %v637_v2 = vsel %vm485_vm1, %v631_v63, 0.0  ;;  %v643_v3 = vmul.f32 %v631_v63, %v631_v63 }
 0x270   : > { %638 = vadd.xlane.f32.xlu1 %v637_v2  ;;  %v634_v4 = vsel %vm485_vm1, %v626_v1, 0.0  ;;  %v642_v5 = vmul.f32 %v626_v1, %v626_v1 }
 0x271   : > { %635 = vadd.xlane.f32.xlu0 %v634_v4  ;;  %v647_v6 = vsel %vm485_vm1, %v643_v3, 0.0 }
 0x272   : > { %v644_v7 = vsel %vm485_vm1, %v642_v5, 0.0 }
 0x274   : > { %648 = vadd.xlane.f32.xlu1 %v647_v6 }
 0x275   : > { %645 = vadd.xlane.f32.xlu0 %v644_v7 }
 0x2fd   : > { %v639_v20 = vpop.xlane.xlu1 %638 }
 0x2fe   : > { %v641_v21 = vmul.f32 0.015625, %v639_v20  ;;  %v636_v22 = vpop.xlane.xlu0 %635 }
 0x2ff   : > { %v640_v23 = vmul.f32 0.015625, %v636_v22 }
 0x300   : > { %v653_v25 = vmul.f32 %v641_v21, %v641_v21  ;;  %v659_v36 = vsub.f32 %v631_v63, %v641_v21 }
 0x301   : > { %v649_v24 = vpop.xlane.xlu1 %648  ;;  %v652_v28 = vmul.f32 %v640_v23, %v640_v23  ;;  %v658_v38 = vsub.f32 %v626_v1, %v640_v23 }
 0x302   : > { %v651_v26 = vmul.f32 0.015625, %v649_v24  ;;  %v646_v27 = vpop.xlane.xlu0 %645 }
 0x303   : > { %v650_v29 = vmul.f32 0.015625, %v646_v27 }
 0x304   : > { %v655_v30 = vsub.f32 %v651_v26, %v653_v25 }
 0x305   : > { %v654_v31 = vsub.f32 %v650_v29, %v652_v28 }
 0x306   : > { %v657_v32 = vmax.f32 %v655_v30, 0.0 }
 0x307   : > { %v656_v33 = vmax.f32 %v654_v31, 0.0 }
 0x308   : > { %v661_v34 = vadd.f32 1e-05, %v657_v32 }
 0x309   : > { %v660_v35 = vadd.f32 1e-05, %v656_v33 }
 0x30a   : > { %991 = vrsqrt.f32 %v661_v34 }
 0x30b   : > { %993 = vrsqrt.f32 %v660_v35 }
 0x314   : > { %v992_v37 = vpop.eup %991 }
 0x315   : > { %v994_v40 = vpop.eup %993  ;;  %v665_v41 = vmul.f32 %v992_v37, %v659_v36 }
 0x316   : > { %v664_v42 = vmul.f32 %v994_v40, %v658_v38 }
 0x317   : > { %v674_v44 = vmul.f32 %v857_v39, %v665_v41 }
 0x318   : > { %v673_v45 = vmul.f32 %v857_v39, %v664_v42 }
 0x319   : > { %v683_v46 = vadd.f32 %v858_v43, %v674_v44 }
 0x31a   : > { %v682_v47 = vadd.f32 %v858_v43, %v673_v45 }
 0x31b   : > { %v685_v49 = vmax.f32 %v683_v46, 0.0 }
 0x31c   : > { %v684_v48 = vmax.f32 %v682_v47, 0.0 }
 0x31e   : > { %936 = vmatprep.mubr.msk.f32.mxu0 %vm485_vm1, %v684_v48 }
 0x31f   : > { %937 = vmatmul.mubr.msk.f32.vlgmr.msra.gmra.mrb[2].mxu0 %vm485_vm1, %v685_v49 }
 0x3f2   : > { %v938_v51 = vpop.f32.mrb[2].mxu0 }
 0x3f3   : > { %v773_v52 = vpop.f32.mrb[3].mxu0  ;;  %v779_v54 = vadd.f32 %v938_v51, %v859_v50 }
 0x3f4   : > { %v774_v53 = vadd.f32 %v859_v50, %v773_v52 }
 0x3f5   : > { %783 = vst [vmem:[%s388_s13 + $0x8] sm:$0xff] %v779_v54 }
 0x3f6   : > { %782 = vst [vmem:[%s388_s13] sm:$0xff] %v774_v53 }
 0x3f7 PF: > { %s21_s17 = sadd.s32 1, %s1001_s17  }
 0x3f8   : > { %p18_p4 = scmp.ge.s32.totalorder %s21_s17, 4  }
 0x3fa   :  { %20 = sbr.rel (!%p18_p4) target bundleno = 1 (0x1), region = 94 }

</bundles_post_ra>
